<compile_context>
chip_gen: v7x
topology: tpu7x:2x2x1
jax: 0.10.0
libtpu: 0.0.40
codegen_flags: <defaults>
</compile_context>

<pallas_src>
import jax
import jax.numpy as jnp
from jax.experimental import pallas as pl
from jax.experimental.pallas import tpu as pltpu

HIDDEN = 256          # fc1/fc2 width (matches the PyTorch module)
SUBLANE_PACK = 16     # bf16 packs 16 rows per sublane group
MAX_BATCH_TILE = 2048 # rows per grid step for very large batches


def _round_up(x, m):
    return (x + m - 1) // m * m


def _cdiv(a, b):
    return (a + b - 1) // b


def critic_kernel(obs_ref, w1_ref, b1_ref, w2_ref, b2_ref, w3_ref, b3_ref,
                  out_ref):
    # fc1 / fc2 on the MXU: bf16 operands, explicit f32 accumulation; bias and
    # ReLU applied in f32.  obs is cast to bf16 here (VPU, hidden under MXU)
    # rather than in the wrapper, so HBM only ever sees the f32 obs once.
    x = obs_ref[...].astype(jnp.bfloat16)                           # (T, D)
    h1 = jnp.dot(x, w1_ref[...], preferred_element_type=jnp.float32)
    h1 = jnp.maximum(h1 + b1_ref[...], 0.0).astype(jnp.bfloat16)    # (T, H)
    h2 = jnp.dot(h1, w2_ref[...], preferred_element_type=jnp.float32)
    h2 = jnp.maximum(h2 + b2_ref[...], 0.0)                         # (T, H) f32
    # fc3 (H -> 1) off the MXU: VPU broadcast-multiply + XLU cross-lane sum.
    # Produces the compact (T, 1) value column directly; no 128-col padding.
    v = jnp.sum(h2 * w3_ref[...], axis=-1, keepdims=True) + b3_ref[...]
    out_ref[...] = v.astype(out_ref.dtype)                          # (T, 1)


def _choose_batch_tile(B):
    # Small batches: a single 16-row-aligned tile (bf16 sublane packing).
    if B < 256:
        return _round_up(max(B, 1), SUBLANE_PACK)
    # Moderate/large batches: always >= 2 tiles so the "parallel" batch axis
    # can shard across v7x's two TensorCores; tiles capped at MAX_BATCH_TILE
    # (few MiB of VMEM per step, far under scoped limits on v5e/v6e/v7x).
    # Power-of-two batches divide exactly, so no padding copy is materialized.
    n_tiles = max(2, _cdiv(B, MAX_BATCH_TILE))
    return _round_up(_cdiv(B, n_tiles), SUBLANE_PACK)


def critic_forward(obs, params, *, batch_tile=None):
    """obs: (B, obs_dim) float32 -> values: (B, 1) float32."""
    w1, b1, w2, b2, w3, b3 = params
    B, obs_dim = obs.shape
    H = w1.shape[1]
    assert H == HIDDEN and w2.shape == (H, H)
    assert w3.shape == (1, H) and b3.shape == (1, 1)

    if batch_tile is None:
        batch_tile = _choose_batch_tile(B)
    assert batch_tile % SUBLANE_PACK == 0, "batch_tile must be 16-row aligned"

    # Pad the batch only when the tile does not divide it (rare for common
    # batch sizes by construction of _choose_batch_tile).
    Bp = _round_up(B, batch_tile)
    if Bp != B:
        obs = jnp.pad(obs, ((0, Bp - B), (0, 0)))

    grid = (Bp // batch_tile,)
    rep = lambda i: (0, 0)  # weights/biases: same block every grid step

    flops = 2 * Bp * (obs_dim * H + H * H + H)
    bytes_accessed = (
        Bp * obs_dim * 4                          # f32 obs (read once)
        + (w1.size + w2.size) * 2                 # bf16 fc1/fc2 weights
        + (w3.size + b1.size + b2.size + b3.size) * 4  # f32 head + biases
        + Bp * 4                                  # compact f32 output
    )

    out = pl.pallas_call(
        critic_kernel,
        out_shape=jax.ShapeDtypeStruct((Bp, 1), jnp.float32),
        grid_spec=pltpu.PrefetchScalarGridSpec(
            num_scalar_prefetch=0,
            grid=grid,
            in_specs=[
                pl.BlockSpec((batch_tile, obs_dim), lambda i: (i, 0)),  # obs f32
                pl.BlockSpec((obs_dim, H), rep),                        # w1 bf16
                pl.BlockSpec((1, H), rep),                              # b1 f32
                pl.BlockSpec((H, H), rep),                              # w2 bf16
                pl.BlockSpec((1, H), rep),                              # b2 f32
                pl.BlockSpec((1, H), rep),                              # w3 row f32
                pl.BlockSpec((1, 1), rep),                              # b3 f32
            ],
            out_specs=pl.BlockSpec((batch_tile, 1), lambda i: (i, 0)),
        ),
        compiler_params=pltpu.CompilerParams(
            dimension_semantics=("parallel",),
            vmem_limit_bytes=32 * 1024 * 1024,
        ),
        cost_estimate=pl.CostEstimate(
            flops=flops, transcendentals=0, bytes_accessed=bytes_accessed),
    )(obs, w1, b1, w2, b2, w3, b3)

    return out[:B]


def init_critic_params(key, obs_dim, hidden=HIDDEN):
    """PyTorch nn.Linear default init: U(-1/sqrt(fan_in), +1/sqrt(fan_in)).
    fc1/fc2 weights are stored bf16 (MXU operands), biases f32.  The fc3 head
    is kept as a single f32 row (1, hidden) plus a scalar bias, matching the
    kernel's VPU/XLU head path (no 128-column padding)."""
    def linear(k, fan_in, fan_out):
        kw, kb = jax.random.split(k)
        bound = 1.0 / jnp.sqrt(jnp.float32(fan_in))
        w = jax.random.uniform(kw, (fan_in, fan_out), jnp.float32, -bound, bound)
        b = jax.random.uniform(kb, (1, fan_out), jnp.float32, -bound, bound)
        return w, b

    k1, k2, k3 = jax.random.split(key, 3)
    w1, b1 = linear(k1, obs_dim, hidden)
    w2, b2 = linear(k2, hidden, hidden)
    w3, b3 = linear(k3, hidden, 1)

    return (w1.astype(jnp.bfloat16), b1,
            w2.astype(jnp.bfloat16), b2,
            w3.T,                       # (1, hidden) f32 head row
            b3)                         # (1, 1) f32 head bias


if __name__ == "__main__":
    key = jax.random.PRNGKey(0)
    k_obs, k_params = jax.random.split(key)

    B, obs_dim = 8, 32          # small synthetic shapes
    obs = jax.random.normal(k_obs, (B, obs_dim), jnp.float32)
    params = init_critic_params(k_params, obs_dim)

    values = jax.block_until_ready(critic_forward(obs, params))

    # Pure-JAX reference mirroring the kernel's precision contract
    # (bf16 operands for fc1/fc2 with f32 accumulation, f32 fc3 head).
    w1, b1, w2, b2, w3, b3 = params
    xb = obs.astype(jnp.bfloat16).astype(jnp.float32)
    r1 = jnp.maximum(xb @ w1.astype(jnp.float32) + b1, 0.0)
    r1 = r1.astype(jnp.bfloat16).astype(jnp.float32)
    r2 = jnp.maximum(r1 @ w2.astype(jnp.float32) + b2, 0.0)
    ref = r2 @ w3.T + b3

    assert values.shape == (B, 1), values.shape
    assert jnp.allclose(values, ref, atol=5e-2, rtol=5e-2), (
        f"max abs err {jnp.max(jnp.abs(values - ref))}")
    print("KERNEL_OK")
</pallas_src>

<mosaic_0001>
module attributes {stable_mosaic.version = 11 : i64} {
  func.func @critic_kernel(%arg0: i32, %arg1: memref<16x32xf32, #tpu.memory_space<vmem>>, %arg2: memref<32x256xbf16, #tpu.memory_space<vmem>>, %arg3: memref<1x256xf32, #tpu.memory_space<vmem>>, %arg4: memref<256x256xbf16, #tpu.memory_space<vmem>>, %arg5: memref<1x256xf32, #tpu.memory_space<vmem>>, %arg6: memref<1x256xf32, #tpu.memory_space<vmem>>, %arg7: memref<1x1xf32, #tpu.memory_space<vmem>>, %arg8: memref<16x1xf32, #tpu.memory_space<vmem>>) attributes {dimension_semantics = [#tpu.dimension_semantics<parallel>], iteration_bounds = array<i64: 1>, scalar_prefetch = 0 : i64, scratch_operands = 0 : i64, tpu.core_type = #tpu.core_type<tc>, window_params = [{transform_indices = @transform_0, window_bounds = array<i64: 16, 32>}, {pipeline_mode = #tpu.pipeline_mode<synchronous>, transform_indices = @transform_1, window_bounds = array<i64: 32, 256>}, {pipeline_mode = #tpu.pipeline_mode<synchronous>, transform_indices = @transform_2, window_bounds = array<i64: 1, 256>}, {pipeline_mode = #tpu.pipeline_mode<synchronous>, transform_indices = @transform_3, window_bounds = array<i64: 256, 256>}, {pipeline_mode = #tpu.pipeline_mode<synchronous>, transform_indices = @transform_4, window_bounds = array<i64: 1, 256>}, {pipeline_mode = #tpu.pipeline_mode<synchronous>, transform_indices = @transform_5, window_bounds = array<i64: 1, 256>}, {pipeline_mode = #tpu.pipeline_mode<synchronous>, transform_indices = @transform_6, window_bounds = array<i64: 1, 1>}, {transform_indices = @transform_7, window_bounds = array<i64: 16, 1>}]} {
    %c0 = arith.constant 0 : index
    %c0_0 = arith.constant 0 : index
    %0 = vector.load %arg1[%c0, %c0_0] : memref<16x32xf32, #tpu.memory_space<vmem>>, vector<16x32xf32>
    %1 = arith.truncf %0 : vector<16x32xf32> to vector<16x32xbf16>
    %c0_1 = arith.constant 0 : index
    %c0_2 = arith.constant 0 : index
    %2 = vector.load %arg2[%c0_1, %c0_2] : memref<32x256xbf16, #tpu.memory_space<vmem>>, vector<32x256xbf16>
    %cst = arith.constant dense<0.000000e+00> : vector<16x256xf32>
    %3 = tpu.matmul %1, %2, %cst {dimension_numbers = #tpu.dot_dimension_numbers<[1], [0], [0], [1], [0, 0, 1, 1], [], []>} : vector<16x32xbf16>, vector<32x256xbf16>, vector<16x256xf32> -> vector<16x256xf32>
    %c0_3 = arith.constant 0 : index
    %c0_4 = arith.constant 0 : index
    %4 = vector.load %arg3[%c0_3, %c0_4] : memref<1x256xf32, #tpu.memory_space<vmem>>, vector<1x256xf32>
    %5 = vector.broadcast %4 : vector<1x256xf32> to vector<16x256xf32>
    %6 = arith.addf %3, %5 : vector<16x256xf32>
    %cst_5 = arith.constant 0.000000e+00 : f32
    %7 = vector.broadcast %cst_5 : f32 to vector<16x256xf32>
    %8 = arith.maximumf %6, %7 : vector<16x256xf32>
    %9 = arith.truncf %8 : vector<16x256xf32> to vector<16x256xbf16>
    %c0_6 = arith.constant 0 : index
    %c0_7 = arith.constant 0 : index
    %10 = vector.load %arg4[%c0_6, %c0_7] : memref<256x256xbf16, #tpu.memory_space<vmem>>, vector<256x256xbf16>
    %cst_8 = arith.constant dense<0.000000e+00> : vector<16x256xf32>
    %11 = tpu.matmul %9, %10, %cst_8 {dimension_numbers = #tpu.dot_dimension_numbers<[1], [0], [0], [1], [0, 0, 1, 1], [], []>} : vector<16x256xbf16>, vector<256x256xbf16>, vector<16x256xf32> -> vector<16x256xf32>
    %c0_9 = arith.constant 0 : index
    %c0_10 = arith.constant 0 : index
    %12 = vector.load %arg5[%c0_9, %c0_10] : memref<1x256xf32, #tpu.memory_space<vmem>>, vector<1x256xf32>
    %13 = vector.broadcast %12 : vector<1x256xf32> to vector<16x256xf32>
    %14 = arith.addf %11, %13 : vector<16x256xf32>
    %cst_11 = arith.constant 0.000000e+00 : f32
    %15 = vector.broadcast %cst_11 : f32 to vector<16x256xf32>
    %16 = arith.maximumf %14, %15 : vector<16x256xf32>
    %c0_12 = arith.constant 0 : index
    %c0_13 = arith.constant 0 : index
    %17 = vector.load %arg6[%c0_12, %c0_13] : memref<1x256xf32, #tpu.memory_space<vmem>>, vector<1x256xf32>
    %18 = vector.broadcast %17 : vector<1x256xf32> to vector<16x256xf32>
    %19 = arith.mulf %16, %18 : vector<16x256xf32>
    %cst_14 = arith.constant dense<0.000000e+00> : vector<16xf32>
    %20 = vector.multi_reduction <add>, %19, %cst_14 [1] : vector<16x256xf32> to vector<16xf32>
    %21 = vector.shape_cast %20 : vector<16xf32> to vector<16x1xf32>
    %c0_15 = arith.constant 0 : index
    %c0_16 = arith.constant 0 : index
    %22 = vector.load %arg7[%c0_15, %c0_16] : memref<1x1xf32, #tpu.memory_space<vmem>>, vector<1x1xf32>
    %23 = vector.broadcast %22 : vector<1x1xf32> to vector<16x1xf32>
    %24 = arith.addf %21, %23 : vector<16x1xf32>
    %c0_17 = arith.constant 0 : index
    %c0_18 = arith.constant 0 : index
    %25 = vector.load %arg8[%c0_17, %c0_18] : memref<16x1xf32, #tpu.memory_space<vmem>>, vector<16x1xf32>
    tpu.vector_store %arg8[%c0_17, %c0_18], %24 {strides = array<i32>} : memref<16x1xf32, #tpu.memory_space<vmem>>, vector<16x1xf32>,
    return
  }
  func.func @transform_0(%arg0: i32) -> (i32, i32) {
    %c0_i32 = arith.constant 0 : i32
    %c0_i32_0 = arith.constant 0 : i32
    return %arg0, %c0_i32 : i32, i32
  }
  func.func @transform_1(%arg0: i32) -> (i32, i32) {
    %c0_i32 = arith.constant 0 : i32
    %c0_i32_0 = arith.constant 0 : i32
    %c0_i32_1 = arith.constant 0 : i32
    return %c0_i32, %c0_i32_0 : i32, i32
  }
  func.func @transform_2(%arg0: i32) -> (i32, i32) {
    %c0_i32 = arith.constant 0 : i32
    %c0_i32_0 = arith.constant 0 : i32
    %c0_i32_1 = arith.constant 0 : i32
    return %c0_i32, %c0_i32_0 : i32, i32
  }
  func.func @transform_3(%arg0: i32) -> (i32, i32) {
    %c0_i32 = arith.constant 0 : i32
    %c0_i32_0 = arith.constant 0 : i32
    %c0_i32_1 = arith.constant 0 : i32
    return %c0_i32, %c0_i32_0 : i32, i32
  }
  func.func @transform_4(%arg0: i32) -> (i32, i32) {
    %c0_i32 = arith.constant 0 : i32
    %c0_i32_0 = arith.constant 0 : i32
    %c0_i32_1 = arith.constant 0 : i32
    return %c0_i32, %c0_i32_0 : i32, i32
  }
  func.func @transform_5(%arg0: i32) -> (i32, i32) {
    %c0_i32 = arith.constant 0 : i32
    %c0_i32_0 = arith.constant 0 : i32
    %c0_i32_1 = arith.constant 0 : i32
    return %c0_i32, %c0_i32_0 : i32, i32
  }
  func.func @transform_6(%arg0: i32) -> (i32, i32) {
    %c0_i32 = arith.constant 0 : i32
    %c0_i32_0 = arith.constant 0 : i32
    %c0_i32_1 = arith.constant 0 : i32
    return %c0_i32, %c0_i32_0 : i32, i32
  }
  func.func @transform_7(%arg0: i32) -> (i32, i32) {
    %c0_i32 = arith.constant 0 : i32
    %c0_i32_0 = arith.constant 0 : i32
    return %arg0, %c0_i32 : i32, i32
  }
}

</mosaic_0001>

<bundles_post_ra>
// kernel: tpu_custom_call.1
= control target key start
LH: loop header
LB: loop body
LE: loop exit
PB: predicated region body
PF: predicated region fallthrough
CT: control target
= control target key end

     0   :  { %s737_s0 = inlined_call_operand.hbm [shape: f32[16,32], index: 0, kind: input, shape index: {}]   ;;  %s738_s1 = inlined_call_operand.hbm [shape: bf16[32,256], index: 1, kind: input, shape index: {}]   ;;  %s739_s2 = inlined_call_operand.vmem [shape: f32[1,256], index: 2, kind: input, shape index: {}]   ;;  %s740_s3 = inlined_call_operand.hbm [shape: bf16[256,256], index: 3, kind: input, shape index: {}]   ;;  %s741_s4 = inlined_call_operand.vmem [shape: f32[1,256], index: 4, kind: input, shape index: {}]   ;;  %s742_s5 = inlined_call_operand.vmem [shape: f32[1,256], index: 5, kind: input, shape index: {}]   ;;  %s743_s6 = inlined_call_operand.<no memory space> [shape: f32[1,1], index: 6, kind: input, shape index: {}]   ;;  %s744_s7 = inlined_call_operand.vmem [shape: f32[16,1], index: 7, kind: output, shape index: {}]  }
   0x1   :  { %v12_v0 = vstv %s743_s6 }
   0x2   :  { %13 = vst [vmem:[#allocation2] sm:$0x1] %v12_v0 }
   0x3   :  { %14 = vsyncpa [#allocation4], 0 }
   0x4   :  { %15 = vsyncpa [#allocation6], 0  ;;  %s621_s26 = smov [#allocation5]   ;;  %s622_s28 = smov [#allocation3]  }
   0x5   :  { %s33_s27 = sshll.u32 %s621_s26, 4  ;;  %s21_s29 = sshll.u32 %s622_s28, 4  ;;  %s34_s27 = int_to_ptr.vmem [resolvable:$true] %s33_s27  ;;  %s670_s29 = int_to_ptr.vmem [resolvable:$true] %s21_s29 }
   0x6   :  { %s551_s9 = scalar_lea.hbm %s738_s1, 512 }
   0x7   :  { %p552_p0 = scmp.ne.s32.totalorder %s738_s1, %s551_s9  ;;  %p555_p1 = scmp.lt.u32.totalorder %s551_s9, %s738_s1 }
   0x9   :  { %p557_p2 = pnand %p555_p1, %p552_p0 }
   0xb   :  { %560 = shalt.err (!%p557_p2)
}
   0xc   :  { %s561_s13 = scalar_lea.vmem %s34_s27, 512  ;;  %p566_p4 = scmp.lt.s32.totalorder %s34_s27, %s34_s27 }
   0xd   :  { %p562_p3 = scmp.ne.s32.totalorder %s34_s27, %s561_s13  ;;  %p567_p5 = scmp.lt.s32.totalorder %s561_s13, %s561_s13 }
   0xf   :  { %p568_p6 = por %p567_p5, %p566_p4 }
  0x11   :  { %p569_p7 = pnand %p568_p6, %p562_p3 }
  0x13   :  { %572 = shalt.err (!%p569_p7)
}
  0x14   :  { %s623_s14 = smov 128   ;;  %s624_s15 = smov 8  }
  0x15   :  { %39 = dma.hbm_to_vmem [thread:$0]  %s738_s1, 512, %s34_s27, [#allocation6], %s623_s14, %s623_s14, %s624_s15  }
  0x16   :  { %s573_s20 = scalar_lea.hbm %s737_s0, 256 }
  0x17   :  { %p574_p8 = scmp.ne.s32.totalorder %s737_s0, %s573_s20  ;;  %p577_p9 = scmp.lt.u32.totalorder %s573_s20, %s737_s0 }
  0x19   :  { %p579_p10 = pnand %p577_p9, %p574_p8 }
  0x1b   :  { %582 = shalt.err (!%p579_p10)
}
  0x1c   :  { %s583_s25 = scalar_lea.vmem %s670_s29, 256  ;;  %p588_p12 = scmp.lt.s32.totalorder %s670_s29, %s670_s29 }
  0x1d   :  { %p584_p11 = scmp.ne.s32.totalorder %s670_s29, %s583_s25  ;;  %p589_p13 = scmp.lt.s32.totalorder %s583_s25, %s583_s25 }
  0x1f   :  { %p590_p0 = por %p589_p13, %p588_p12 }
  0x21   :  { %p591_p1 = pnand %p590_p0, %p584_p11 }
  0x23   :  { %594 = shalt.err (!%p591_p1)
}
  0x24   :  { %27 = dma.hbm_to_vmem [thread:$0]  %s737_s0, 256, %s670_s29, [#allocation4], %s623_s14, %s623_s14, %s624_s15  }
  0x25   :  { %s625_s27 = smov [#allocation7]   ;;  %s595_s9 = scalar_lea.hbm %s740_s3, 4096 }
  0x26   :  { %s47_s28 = sshll.u32 %s625_s27, 4  ;;  %p596_p2 = scmp.ne.s32.totalorder %s740_s3, %s595_s9  ;;  %s48_s28 = int_to_ptr.vmem [resolvable:$true] %s47_s28 }
  0x27   :  { %p599_p3 = scmp.lt.u32.totalorder %s595_s9, %s740_s3 }
  0x29   :  { %p601_p4 = pnand %p599_p3, %p596_p2 }
  0x2b   :  { %604 = shalt.err (!%p601_p4)
}
  0x2c   :  { %s605_s13 = scalar_lea.vmem %s48_s28, 4096  ;;  %p610_p6 = scmp.lt.s32.totalorder %s48_s28, %s48_s28 }
  0x2d   :  { %p606_p5 = scmp.ne.s32.totalorder %s48_s28, %s605_s13  ;;  %p611_p7 = scmp.lt.s32.totalorder %s605_s13, %s605_s13 }
  0x2f   :  { %p612_p8 = por %p611_p7, %p610_p6 }
  0x31   :  { %p613_p9 = pnand %p612_p8, %p606_p5 }
  0x33   :  { %616 = shalt.err (!%p613_p9)
}
  0x34   :  { %53 = dma.hbm_to_vmem [thread:$0]  %s740_s3, 4096, %s48_s28, [#allocation6], %s623_s14, %s623_s14, %s624_s15  }
  0x35   :  { %617 = dma.done.wait [#allocation4], 256  }
  0x36   :  { %618 = vsyncadd [#allocation4], 4294967040 }
  0x37   :  { %619 = dma.done.wait [#allocation6], 4608  }
  0x38   :  { %620 = vsyncadd [#allocation6], 4294962688  ;;  %v626_v1 = vmov 0   ;;  %v497_v2 = vld [vmem:[#allocation5 + $0x4] ss:$8 sps:$4 sm:$0xff]   ;;  %v70_v6 = vld [vmem:[#allocation3] sm:$0xff]  ;;  %v79_v41 = vlaneseq }
  0x39   :  { %145 = vmatprep.mubr.bf16.mxu0 %v626_v1  ;;  %v499_v3 = vld [vmem:[#allocation5] ss:$8 sps:$4 sm:$0xff]   ;;  %113 = vmatprep.subr.bf16.mxu0 %v497_v2  ;;  %v500_v4 = vld [vmem:[#allocation5 + $0x14] ss:$8 sps:$4 sm:$0xff]   ;;  %v502_v5 = vld [vmem:[#allocation5 + $0x10] ss:$8 sps:$4 sm:$0xff]  }
  0x3a   :  { %114 = vmatpush1.bf16.msra.mxu0 %v499_v3  ;;  %v71_v7 = vld [vmem:[#allocation3 + $0x8] sm:$0xff]  ;;  %v503_v8 = vld [vmem:[#allocation7 + $0x4] ss:$8 sps:$4 sm:$0xff]   ;;  %v505_v9 = vld [vmem:[#allocation7] ss:$8 sps:$4 sm:$0xff]   ;;  %vm109_vm0 = vcmask 261120  }
  0x3b   :  { %115 = vmatprep.subr.bf16.mxu0 %v500_v4  ;;  %v506_v10 = vld [vmem:[#allocation7 + $0x14] ss:$8 sps:$4 sm:$0xff]   ;;  %v72_v11 = vpack.c.bf16 %v71_v7, %v70_v6  ;;  %366 = vmatprep.subr.bf16.mxu1 %v503_v8  ;;  %v508_v12 = vld [vmem:[#allocation7 + $0x10] ss:$8 sps:$4 sm:$0xff]   ;;  %v509_v13 = vld [vmem:[#allocation7 + $0x24] ss:$8 sps:$4 sm:$0xff]  }
  0x3c   :  { %367 = vmatpush1.bf16.msra.mxu1 %v505_v9  ;;  %v511_v14 = vld [vmem:[#allocation7 + $0x20] ss:$8 sps:$4 sm:$0xff]   ;;  %v512_v15 = vld [vmem:[#allocation7 + $0x34] ss:$8 sps:$4 sm:$0xff]   ;;  %v514_v16 = vld [vmem:[#allocation7 + $0x30] ss:$8 sps:$4 sm:$0xff]  }
  0x3d   :  { %368 = vmatprep.subr.bf16.mxu1 %v506_v10  ;;  %v515_v17 = vld [vmem:[#allocation7 + $0x44] ss:$8 sps:$4 sm:$0xff]   ;;  %v517_v18 = vld [vmem:[#allocation7 + $0x40] ss:$8 sps:$4 sm:$0xff]   ;;  %v518_v19 = vld [vmem:[#allocation7 + $0x54] ss:$8 sps:$4 sm:$0xff]  }
  0x3e   :  { %116 = vmatpush1.bf16.msra.mxu0 %v502_v5  ;;  %v520_v20 = vld [vmem:[#allocation7 + $0x50] ss:$8 sps:$4 sm:$0xff]   ;;  %v521_v21 = vld [vmem:[#allocation7 + $0x64] ss:$8 sps:$4 sm:$0xff]   ;;  %v523_v22 = vld [vmem:[#allocation7 + $0x60] ss:$8 sps:$4 sm:$0xff]  }
  0x3f   :  { %v524_v23 = vld [vmem:[#allocation7 + $0x74] ss:$8 sps:$4 sm:$0xff]   ;;  %v526_v24 = vld [vmem:[#allocation7 + $0x70] ss:$8 sps:$4 sm:$0xff]   ;;  %v527_v25 = vld [vmem:[#allocation7 + $0x84] ss:$8 sps:$4 sm:$0xff]  }
  0x40   :  { %369 = vmatpush1.bf16.msra.mxu1 %v508_v12  ;;  %v529_v26 = vld [vmem:[#allocation7 + $0x80] ss:$8 sps:$4 sm:$0xff]   ;;  %v530_v27 = vld [vmem:[#allocation7 + $0x94] ss:$8 sps:$4 sm:$0xff]   ;;  %v532_v28 = vld [vmem:[#allocation7 + $0x90] ss:$8 sps:$4 sm:$0xff]  }
  0x41   :  { %457 = vmatmul.mubr.msk.bf16.vlgmr.msra.gmra.mrb[0].mxu0 %vm109_vm0, %v72_v11  ;;  %370 = vmatprep.subr.bf16.mxu1 %v509_v13  ;;  %v533_v29 = vld [vmem:[#allocation7 + $0xa4] ss:$8 sps:$4 sm:$0xff]   ;;  %v535_v30 = vld [vmem:[#allocation7 + $0xa0] ss:$8 sps:$4 sm:$0xff]   ;;  %v536_v31 = vld [vmem:[#allocation7 + $0xb4] ss:$8 sps:$4 sm:$0xff]  }
  0x42   :  { %v538_v32 = vld [vmem:[#allocation7 + $0xb0] ss:$8 sps:$4 sm:$0xff]   ;;  %v539_v33 = vld [vmem:[#allocation7 + $0xc4] ss:$8 sps:$4 sm:$0xff]   ;;  %v541_v34 = vld [vmem:[#allocation7 + $0xc0] ss:$8 sps:$4 sm:$0xff]  }
  0x43   :  { %v542_v35 = vld [vmem:[#allocation7 + $0xd4] ss:$8 sps:$4 sm:$0xff]   ;;  %v544_v36 = vld [vmem:[#allocation7 + $0xd0] ss:$8 sps:$4 sm:$0xff]   ;;  %v545_v37 = vld [vmem:[#allocation7 + $0xe4] ss:$8 sps:$4 sm:$0xff]  }
  0x44   :  { %371 = vmatpush1.bf16.msra.mxu1 %v511_v14  ;;  %v547_v38 = vld [vmem:[#allocation7 + $0xe0] ss:$8 sps:$4 sm:$0xff]   ;;  %v548_v39 = vld [vmem:[#allocation7 + $0xf4] ss:$8 sps:$4 sm:$0xff]   ;;  %v550_v40 = vld [vmem:[#allocation7 + $0xf0] ss:$8 sps:$4 sm:$0xff]  }
  0x45   :  { %372 = vmatprep.subr.bf16.mxu1 %v512_v15  ;;  %v80_v42 = vshrl.u32 %v79_v41, 7  ;;  %v77_v44 = vld [vmem:[%s739_s2] sm:$0x3]  ;;  %vm444_vm1 = vcmask 7168  }
  0x46   :  { %v194_v62 = vld [vmem:[%s741_s4] sm:$0x3] }
  0x47   :  { %v81_v43 = vsub.s32 0, %v80_v42  ;;  %v85_v45 = vsub.s32 1, %v80_v42  ;;  %v413_v1 = vld [vmem:[%s742_s5] sm:$0x3] }
  0x48   :  { %373 = vmatpush1.bf16.msra.mxu1 %v514_v16 }
  0x49   :  { %374 = vmatprep.subr.bf16.mxu1 %v515_v17  ;;  %v82_v46 = vrot.slane %v77_v44, %v81_v43  ;;  %v86_v47 = vrot.slane %v77_v44, %v85_v45  ;;  %v199_v63 = vrot.slane %v194_v62, %v81_v43  ;;  %v203_v0 = vrot.slane %v194_v62, %v85_v45 }
  0x4a   :  { %v418_v5 = vrot.slane %v413_v1, %v81_v43  ;;  %v422_v8 = vrot.slane %v413_v1, %v85_v45 }
  0x4c   :  { %375 = vmatpush1.bf16.msra.mxu1 %v517_v18 }
  0x4d   :  { %376 = vmatprep.subr.bf16.mxu1 %v518_v19 }
  0x50   :  { %377 = vmatpush1.bf16.msra.mxu1 %v520_v20 }
  0x51   :  { %378 = vmatprep.subr.bf16.mxu1 %v521_v21 }
  0x54   :  { %379 = vmatpush1.bf16.msra.mxu1 %v523_v22  ;;  %v490_v22 = vld [vmem:[#allocation2] ss:$0 sm:$0xff] }
  0x55   :  { %380 = vmatprep.subr.bf16.mxu1 %v524_v23 }
  0x58   :  { %381 = vmatpush1.bf16.msra.mxu1 %v526_v24 }
  0x59   :  { %382 = vmatprep.subr.bf16.mxu1 %v527_v25 }
  0x5c   :  { %383 = vmatpush1.bf16.msra.mxu1 %v529_v26 }
  0x5d   :  { %384 = vmatprep.subr.bf16.mxu1 %v530_v27 }
  0x60   :  { %385 = vmatpush1.bf16.msra.mxu1 %v532_v28 }
  0x61   :  { %386 = vmatprep.subr.bf16.mxu1 %v533_v29 }
  0x64   :  { %387 = vmatpush1.bf16.msra.mxu1 %v535_v30 }
  0x65   :  { %388 = vmatprep.subr.bf16.mxu1 %v536_v31 }
  0x68   :  { %389 = vmatpush1.bf16.msra.mxu1 %v538_v32 }
  0x69   :  { %390 = vmatprep.subr.bf16.mxu1 %v539_v33 }
  0x6c   :  { %391 = vmatpush1.bf16.msra.mxu1 %v541_v34 }
  0x6d   :  { %392 = vmatprep.subr.bf16.mxu1 %v542_v35 }
  0x70   :  { %393 = vmatpush1.bf16.msra.mxu1 %v544_v36 }
  0x71   :  { %394 = vmatprep.subr.bf16.mxu1 %v545_v37 }
  0x74   :  { %395 = vmatpush1.bf16.msra.mxu1 %v547_v38 }
  0x75   :  { %396 = vmatprep.subr.bf16.mxu1 %v548_v39 }
  0x78   :  { %397 = vmatpush1.bf16.msra.mxu1 %v550_v40 }
 0x114   :  { %v147_v48 = vpop.f32.mrb[0].mxu0 }
 0x115   :  { %v148_v49 = vadd.f32 %v147_v48, %v82_v46  ;;  %v149_v50 = vpop.f32.mrb[1].mxu0 }
 0x116   :  { %v150_v51 = vadd.f32 %v149_v50, %v86_v47  ;;  %v151_v52 = vpop.f32.mrb[2].mxu0 }
 0x117   :  { %v152_v53 = vadd.f32 %v151_v52, %v82_v46  ;;  %v153_v54 = vpop.f32.mrb[3].mxu0  ;;  %v156_v56 = vmax.f32 %v148_v49, 0.0 }
 0x118   :  { %v154_v55 = vadd.f32 %v153_v54, %v86_v47  ;;  %v157_v58 = vmax.f32 %v150_v51, 0.0 }
 0x119   :  { %v158_v57 = vmax.f32 %v152_v53, 0.0 }
 0x11a   :  { %v159_v59 = vmax.f32 %v154_v55, 0.0 }
 0x11b   :  { %v160_v60 = vpack.c.bf16 %v158_v57, %v156_v56 }
 0x11c   :  { %v161_v61 = vpack.c.bf16 %v159_v59, %v157_v58 }
 0x11e   :  { %398 = vmatprep.mubr.bf16.mxu1 %v161_v61 }
 0x11f   :  { %399 = vmatmul.mubr.bf16.vlgmr.msra.gmra.mrb[0].mxu1 %v160_v60 }
 0x1f2   :  { %v400_v2 = vpop.f32.mrb[0].mxu1 }
 0x1f3   :  { %v401_v3 = vadd.f32 %v400_v2, %v199_v63  ;;  %v402_v4 = vpop.f32.mrb[1].mxu1 }
 0x1f4   :  { %v403_v6 = vadd.f32 %v402_v4, %v203_v0  ;;  %v404_v7 = vpop.f32.mrb[2].mxu1 }
 0x1f5   :  { %v409_v9 = vmax.f32 %v401_v3, 0.0  ;;  %v405_v10 = vadd.f32 %v404_v7, %v199_v63  ;;  %v406_v11 = vpop.f32.mrb[3].mxu1 }
 0x1f6   :  { %v410_v12 = vmax.f32 %v403_v6, 0.0  ;;  %v407_v13 = vadd.f32 %v406_v11, %v203_v0 }
 0x1f7   :  { %v411_v14 = vmax.f32 %v405_v10, 0.0  ;;  %v425_v15 = vmul.f32 %v418_v5, %v409_v9 }
 0x1f8   :  { %v412_v16 = vmax.f32 %v407_v13, 0.0  ;;  %v426_v17 = vmul.f32 %v422_v8, %v410_v12 }
 0x1f9   :  { %v427_v18 = vmul.f32 %v418_v5, %v411_v14 }
 0x1fa   :  { %v428_v19 = vmul.f32 %v422_v8, %v412_v16  ;;  %v429_v20 = vadd.f32 %v426_v17, %v425_v15 }
 0x1fc   :  { %430 = vadd.xlane.f32.xlu0 %v429_v20  ;;  %v432_v21 = vadd.f32 %v428_v19, %v427_v18 }
 0x200   :  { %433 = vadd.xlane.f32.xlu0 %v432_v21 }
 0x289   :  { %v431_v23 = vpop.xlane.xlu0 %430 }
 0x28a   :  { %v442_v24 = vadd.f32 %v490_v22, %v431_v23 }
 0x28c   :  { %445 = vst.msk [vmem:[%s744_s7] sm:$0xff] %vm444_vm1, %v442_v24 }
 0x28d   :  { %v434_v25 = vpop.xlane.xlu0 %433 }
 0x28e   :  { %v443_v26 = vadd.f32 %v490_v22, %v434_v25 }
 0x290   :  { %446 = vst.msk [vmem:[%s744_s7 + $0x8] sm:$0xff] %vm444_vm1, %v443_v26 }
 0x291   :  { %451 = vsyncpa [#allocation4], 1 }
 0x292   :  { %452 = vsyncpa [#allocation6], 1 }

</bundles_post_ra>
